<compile_context>
chip_gen: v7x
topology: tpu7x:2x2x1
jax: 0.10.0
libtpu: 0.0.40
codegen_flags: <defaults>
</compile_context>

<pallas_src>
import jax
import jax.numpy as jnp
from jax.experimental import pallas as pl
from jax.experimental.pallas import tpu as pltpu


# --------------------------------------------------------------------------- #
# Kernel
# --------------------------------------------------------------------------- #
def _cdt_ce_kernel(x_ref, tgt_ref, delta_ref, loss_ref, m_ref, l_ref):
    """One (tb, tc) tile of the fused CDT-scaled online-logsumexp CE.

    x_ref:     (tb, tc) logits, native dtype, VMEM
    tgt_ref:   (tb, 1)  f32 target logit already scaled by Delta[target]
    delta_ref: (1, tc)  f32 per-class CDT scale
    loss_ref:  (tb, 1)  f32 per-row CE loss (written at the last class tile)
    m_ref:     (tb, 1)  f32 scratch, running max
    l_ref:     (tb, 1)  f32 scratch, running exp-sum
    """
    k = pl.program_id(1)
    nk = pl.num_programs(1)

    @pl.when(k == 0)
    def _():
        m_ref[...] = jnp.full_like(m_ref, -jnp.inf)
        l_ref[...] = jnp.zeros_like(l_ref)

    # CDT scaling fused into the streaming logsumexp.  Cast AFTER the VMEM
    # load so bf16 inputs keep their halved HBM traffic.
    z = x_ref[...].astype(jnp.float32) * delta_ref[...].astype(jnp.float32)

    m_prev = m_ref[...]
    m_new = jnp.maximum(m_prev, jnp.max(z, axis=-1, keepdims=True))
    alpha = jnp.exp(m_prev - m_new)          # exp(-inf) == 0 on the first tile
    l_ref[...] = alpha * l_ref[...] + jnp.sum(jnp.exp(z - m_new), axis=-1,
                                              keepdims=True)
    m_ref[...] = m_new

    @pl.when(k == nk - 1)
    def _():
        loss_ref[...] = m_ref[...] + jnp.log(l_ref[...]) - tgt_ref[...]


# --------------------------------------------------------------------------- #
# Generation-aware tile / VMEM heuristics
# --------------------------------------------------------------------------- #
def _num_parallel_cores():
    """TensorCores a 'parallel' grid axis is sharded across (v7x / megacore)."""
    try:
        d = jax.devices()[0]
        kind = (getattr(d, "device_kind", "") or "").lower()
        if "v7" in kind or "v4" in kind or "v5p" in kind:
            return 2
    except Exception:
        pass
    return 1


def _vmem_capacity_bytes():
    try:
        cap = getattr(pltpu.get_tpu_info(), "vmem_capacity_bytes", None)
        if cap:
            return int(cap)
    except Exception:
        pass
    return 64 * 1024 * 1024        # conservative (v7x per-TC) fallback


def _min_row_tile(itemsize):
    # dtype minimum sublane tile: 8 for 32-bit, 16 for 16-bit, 32 for 8-bit.
    return {4: 8, 2: 16, 1: 32}.get(itemsize, 8)


def _pick_row_tile(B, itemsize, n_cores):
    min_tb = _min_row_tile(itemsize)
    cands = [c for c in (256, 128, 64, 32, 16, 8) if c >= min_tb]
    if n_cores > 1:
        # 2-TC chips: want a block count that is a (non-zero) multiple of the
        # core count so neither core idles.
        for c in cands:
            if B % c == 0 and B // c >= n_cores and (B // c) % n_cores == 0:
                return c
    # Single-TC chips (v5e/v6e) or no balanced split: one big block for small
    # B (avoids per-grid-step overhead), else the largest dividing candidate.
    if B <= 256:
        return B
    for c in cands:
        if B % c == 0:
            return c
    return B                       # last resort: full batch as one block


def _pick_class_tile(C_pad, tb, itemsize, budget_bytes):
    # Live bytes per class step ~= double-buffered native-dtype logits block
    # (2*tb*tc*itemsize) + the f32 intermediate z (tb*tc*4).
    per_elem = 2 * itemsize + 4
    for cand in (8192, 4096, 2048, 1024, 512, 256, 128):
        if C_pad % cand == 0 and tb * cand * per_elem <= budget_bytes:
            return cand
    return 128                     # C_pad is always a multiple of 128


# --------------------------------------------------------------------------- #
# Wrapper
# --------------------------------------------------------------------------- #
def cdt_loss(x, target, delta_list, *, gamma=0.5, reduction=None,
             tb=None, tc=None):
    """Pallas forward of CDTLoss (weight=None).

    x:          (B, C) logits (float dtype; math done in f32 in-kernel)
    target:     (B,)   integer class indices
    delta_list: (C,)   raw per-class deltas/counts (as passed to the torch ctor)
    """
    # TODO(synk): the per-class CE `weight` argument (None in this config) is
    # not implemented.
    if not jnp.issubdtype(x.dtype, jnp.floating):
        x = x.astype(jnp.float32)
    B, C = x.shape
    itemsize = jnp.dtype(x.dtype).itemsize

    # One-time per-class constant, identical to CDTLoss.__init__.
    delta = jnp.asarray(delta_list, jnp.float32) ** gamma
    delta = C * delta / jnp.sum(delta)                               # (C,)

    # Wrapper-side target-logit gather (B elements -> negligible traffic).
    tgt_idx = target.astype(jnp.int32)
    tgt_logit = jnp.take_along_axis(x, tgt_idx[:, None], axis=1).astype(jnp.float32)
    tgt_logit = tgt_logit * jnp.take(delta, tgt_idx)[:, None]        # (B, 1) f32

    # Pad the class axis to a lane multiple; padded logits are -inf and padded
    # Delta is 1 so padded lanes contribute exactly 0 to the logsumexp.
    C_pad = ((C + 127) // 128) * 128
    if C_pad != C:
        x = jnp.pad(x, ((0, 0), (0, C_pad - C)),
                    constant_values=float("-inf"))
        delta = jnp.pad(delta, (0, C_pad - C), constant_values=1.0)
    delta2d = delta.reshape(1, C_pad)

    # Generation-aware budgets.
    n_cores = _num_parallel_cores()
    vmem_cap = _vmem_capacity_bytes()
    vmem_limit = min(vmem_cap // 2, 64 * 1024 * 1024)    # 64 MiB v5e/v6e, 32 MiB v7x
    tile_budget = min(vmem_limit // 2, 20 * 1024 * 1024)

    min_tb = _min_row_tile(itemsize)
    if tb is None:
        tb = _pick_row_tile(B, itemsize, n_cores)
    if tc is None:
        tc = _pick_class_tile(C_pad, tb, itemsize, tile_budget)
    assert B % tb == 0, (B, tb)
    assert tb == B or tb % min_tb == 0, (tb, min_tb, str(x.dtype))
    assert C_pad % tc == 0 and (tc % 128 == 0 or tc == C_pad), (C_pad, tc)

    per_row = pl.pallas_call(
        _cdt_ce_kernel,
        out_shape=jax.ShapeDtypeStruct((B, 1), jnp.float32),
        grid_spec=pltpu.PrefetchScalarGridSpec(
            num_scalar_prefetch=0,
            grid=(B // tb, C_pad // tc),
            in_specs=[
                pl.BlockSpec((tb, tc), lambda i, k: (i, k)),   # logits (native dtype)
                pl.BlockSpec((tb, 1), lambda i, k: (i, 0)),    # target logit * Delta
                pl.BlockSpec((1, tc), lambda i, k: (0, k)),    # CDT Delta row
            ],
            out_specs=pl.BlockSpec((tb, 1), lambda i, k: (i, 0)),
            scratch_shapes=[pltpu.VMEM((tb, 1), jnp.float32)] * 2,
        ),
        compiler_params=pltpu.CompilerParams(
            dimension_semantics=("parallel", "arbitrary"),
            vmem_limit_bytes=int(vmem_limit)),
    )(x, tgt_logit, delta2d)

    per_row = per_row[:, 0]
    if reduction == 'sum':
        return jnp.sum(per_row)
    return jnp.mean(per_row)       # torch F.cross_entropy default reduction


# --------------------------------------------------------------------------- #
# Plain-JAX reference (for the self-check)
# --------------------------------------------------------------------------- #
def _reference(x, target, delta_list, *, gamma=0.5, reduction=None):
    C = x.shape[1]
    delta = jnp.asarray(delta_list, jnp.float32) ** gamma
    delta = C * delta / jnp.sum(delta)
    z = x.astype(jnp.float32) * delta[None, :]
    lse = jax.scipy.special.logsumexp(z, axis=-1)
    tgt = jnp.take_along_axis(z, target[:, None].astype(jnp.int32), axis=1)[:, 0]
    per = lse - tgt
    return jnp.sum(per) if reduction == 'sum' else jnp.mean(per)


if __name__ == "__main__":
    key = jax.random.PRNGKey(0)
    k1, k2, k3, k4 = jax.random.split(key, 4)

    # ---- Test 1: f32, explicit tiles -> grid (2, 2): exercises the megacore
    #      batch split AND the multi-tile online-logsumexp path. --------------
    B1, C1 = 128, 512
    x1 = jax.random.normal(k1, (B1, C1), jnp.float32)
    t1 = jax.random.randint(k2, (B1,), 0, C1, dtype=jnp.int32)
    d1 = 1.0 + jnp.arange(C1, dtype=jnp.float32) % 17.0
    loss1 = cdt_loss(x1, t1, d1, gamma=0.5, reduction=None, tb=64, tc=256)
    ref1 = _reference(x1, t1, d1, gamma=0.5, reduction=None)

    # ---- Test 2: bf16 logits, C not a multiple of 128 (padding path), auto
    #      generation-aware tiles, sum reduction. -----------------------------
    B2, C2 = 96, 500
    x2 = jax.random.normal(k3, (B2, C2), jnp.float32).astype(jnp.bfloat16)
    t2 = jax.random.randint(k4, (B2,), 0, C2, dtype=jnp.int32)
    d2 = 1.0 + (jnp.arange(C2, dtype=jnp.float32) % 11.0) * 3.0
    loss2 = cdt_loss(x2, t2, d2, gamma=0.5, reduction='sum')
    ref2 = _reference(x2, t2, d2, gamma=0.5, reduction='sum')

    loss1, loss2 = jax.block_until_ready((loss1, loss2))

    assert jnp.allclose(loss1, ref1, rtol=1e-4, atol=1e-4), (loss1, ref1)
    assert jnp.allclose(loss2, ref2, rtol=1e-3, atol=1e-3), (loss2, ref2)
    print("KERNEL_OK")
</pallas_src>

<mosaic_0001>
module attributes {stable_mosaic.version = 11 : i64} {
  func.func @_cdt_ce_kernel(%arg0: i32, %arg1: i32, %arg2: memref<64x256xf32, #tpu.memory_space<vmem>>, %arg3: memref<64x1xf32, #tpu.memory_space<vmem>>, %arg4: memref<1x256xf32, #tpu.memory_space<vmem>>, %arg5: memref<64x1xf32, #tpu.memory_space<vmem>>, %arg6: memref<64x1xf32, #tpu.memory_space<vmem>>, %arg7: memref<64x1xf32, #tpu.memory_space<vmem>>) attributes {dimension_semantics = [#tpu.dimension_semantics<parallel>, #tpu.dimension_semantics<arbitrary>], iteration_bounds = array<i64: 2, 2>, scalar_prefetch = 0 : i64, scratch_operands = 2 : i64, tpu.core_type = #tpu.core_type<tc>, window_params = [{transform_indices = @transform_0, window_bounds = array<i64: 64, 256>}, {transform_indices = @transform_1, window_bounds = array<i64: 64, 1>}, {transform_indices = @transform_2, window_bounds = array<i64: 1, 256>}, {transform_indices = @transform_3, window_bounds = array<i64: 64, 1>}]} {
    %c0_i32 = arith.constant 0 : i32
    %0 = arith.cmpi eq, %arg1, %c0_i32 : i32
    %1 = arith.extui %0 : i1 to i32
    %c0_i32_0 = arith.constant 0 : i32
    %2 = arith.cmpi ne, %1, %c0_i32_0 : i32
    scf.if %2 {
      %cst_14 = arith.constant 0xFF800000 : f32
      %26 = vector.broadcast %cst_14 : f32 to vector<64x1xf32>
      %c0_15 = arith.constant 0 : index
      %c0_16 = arith.constant 0 : index
      %27 = vector.load %arg6[%c0_15, %c0_16] : memref<64x1xf32, #tpu.memory_space<vmem>>, vector<64x1xf32>
      tpu.vector_store %arg6[%c0_15, %c0_16], %26 {strides = array<i32>} : memref<64x1xf32, #tpu.memory_space<vmem>>, vector<64x1xf32>,
      %cst_17 = arith.constant 0.000000e+00 : f32
      %28 = vector.broadcast %cst_17 : f32 to vector<64x1xf32>
      %c0_18 = arith.constant 0 : index
      %c0_19 = arith.constant 0 : index
      %29 = vector.load %arg7[%c0_18, %c0_19] : memref<64x1xf32, #tpu.memory_space<vmem>>, vector<64x1xf32>
      tpu.vector_store %arg7[%c0_18, %c0_19], %28 {strides = array<i32>} : memref<64x1xf32, #tpu.memory_space<vmem>>, vector<64x1xf32>,
    } else {
    }
    %c0 = arith.constant 0 : index
    %c0_1 = arith.constant 0 : index
    %3 = vector.load %arg2[%c0, %c0_1] : memref<64x256xf32, #tpu.memory_space<vmem>>, vector<64x256xf32>
    %c0_2 = arith.constant 0 : index
    %c0_3 = arith.constant 0 : index
    %4 = vector.load %arg4[%c0_2, %c0_3] : memref<1x256xf32, #tpu.memory_space<vmem>>, vector<1x256xf32>
    %5 = vector.broadcast %4 : vector<1x256xf32> to vector<64x256xf32>
    %6 = arith.mulf %3, %5 : vector<64x256xf32>
    %c0_4 = arith.constant 0 : index
    %c0_5 = arith.constant 0 : index
    %7 = vector.load %arg6[%c0_4, %c0_5] : memref<64x1xf32, #tpu.memory_space<vmem>>, vector<64x1xf32>
    %cst = arith.constant dense<0xFF800000> : vector<64xf32>
    %8 = vector.multi_reduction <maximumf>, %6, %cst [1] : vector<64x256xf32> to vector<64xf32>
    %9 = vector.shape_cast %8 : vector<64xf32> to vector<64x1xf32>
    %10 = arith.maximumf %7, %9 : vector<64x1xf32>
    %11 = arith.subf %7, %10 : vector<64x1xf32>
    %12 = math.exp %11 : vector<64x1xf32>
    %c0_6 = arith.constant 0 : index
    %c0_7 = arith.constant 0 : index
    %13 = vector.load %arg7[%c0_6, %c0_7] : memref<64x1xf32, #tpu.memory_space<vmem>>, vector<64x1xf32>
    %14 = arith.mulf %12, %13 : vector<64x1xf32>
    %15 = vector.broadcast %10 : vector<64x1xf32> to vector<64x256xf32>
    %16 = arith.subf %6, %15 : vector<64x256xf32>
    %17 = math.exp %16 : vector<64x256xf32>
    %cst_8 = arith.constant dense<0.000000e+00> : vector<64xf32>
    %18 = vector.multi_reduction <add>, %17, %cst_8 [1] : vector<64x256xf32> to vector<64xf32>
    %19 = vector.shape_cast %18 : vector<64xf32> to vector<64x1xf32>
    %20 = arith.addf %14, %19 : vector<64x1xf32>
    %c0_9 = arith.constant 0 : index
    %c0_10 = arith.constant 0 : index
    %21 = vector.load %arg7[%c0_9, %c0_10] : memref<64x1xf32, #tpu.memory_space<vmem>>, vector<64x1xf32>
    tpu.vector_store %arg7[%c0_9, %c0_10], %20 {strides = array<i32>} : memref<64x1xf32, #tpu.memory_space<vmem>>, vector<64x1xf32>,
    %c0_11 = arith.constant 0 : index
    %c0_12 = arith.constant 0 : index
    %22 = vector.load %arg6[%c0_11, %c0_12] : memref<64x1xf32, #tpu.memory_space<vmem>>, vector<64x1xf32>
    tpu.vector_store %arg6[%c0_11, %c0_12], %10 {strides = array<i32>} : memref<64x1xf32, #tpu.memory_space<vmem>>, vector<64x1xf32>,
    %c1_i32 = arith.constant 1 : i32
    %23 = arith.cmpi eq, %arg1, %c1_i32 : i32
    %24 = arith.extui %23 : i1 to i32
    %c0_i32_13 = arith.constant 0 : i32
    %25 = arith.cmpi ne, %24, %c0_i32_13 : i32
    scf.if %25 {
      %c0_14 = arith.constant 0 : index
      %c0_15 = arith.constant 0 : index
      %26 = vector.load %arg6[%c0_14, %c0_15] : memref<64x1xf32, #tpu.memory_space<vmem>>, vector<64x1xf32>
      %c0_16 = arith.constant 0 : index
      %c0_17 = arith.constant 0 : index
      %27 = vector.load %arg7[%c0_16, %c0_17] : memref<64x1xf32, #tpu.memory_space<vmem>>, vector<64x1xf32>
      %28 = math.log %27 : vector<64x1xf32>
      %29 = arith.addf %26, %28 : vector<64x1xf32>
      %c0_18 = arith.constant 0 : index
      %c0_19 = arith.constant 0 : index
      %30 = vector.load %arg3[%c0_18, %c0_19] : memref<64x1xf32, #tpu.memory_space<vmem>>, vector<64x1xf32>
      %31 = arith.subf %29, %30 : vector<64x1xf32>
      %c0_20 = arith.constant 0 : index
      %c0_21 = arith.constant 0 : index
      %32 = vector.load %arg5[%c0_20, %c0_21] : memref<64x1xf32, #tpu.memory_space<vmem>>, vector<64x1xf32>
      tpu.vector_store %arg5[%c0_20, %c0_21], %31 {strides = array<i32>} : memref<64x1xf32, #tpu.memory_space<vmem>>, vector<64x1xf32>,
    } else {
    }
    return
  }
  func.func @transform_0(%arg0: i32, %arg1: i32) -> (i32, i32) {
    %c0_i32 = arith.constant 0 : i32
    return %arg0, %arg1 : i32, i32
  }
  func.func @transform_1(%arg0: i32, %arg1: i32) -> (i32, i32) {
    %c0_i32 = arith.constant 0 : i32
    %c0_i32_0 = arith.constant 0 : i32
    return %arg0, %c0_i32 : i32, i32
  }
  func.func @transform_2(%arg0: i32, %arg1: i32) -> (i32, i32) {
    %c0_i32 = arith.constant 0 : i32
    %c0_i32_0 = arith.constant 0 : i32
    return %c0_i32, %arg1 : i32, i32
  }
  func.func @transform_3(%arg0: i32, %arg1: i32) -> (i32, i32) {
    %c0_i32 = arith.constant 0 : i32
    %c0_i32_0 = arith.constant 0 : i32
    return %arg0, %c0_i32 : i32, i32
  }
}

</mosaic_0001>

<bundles_post_ra>
// kernel: tpu_custom_call.1
= control target key start
LH: loop header
LB: loop body
LE: loop exit
PB: predicated region body
PF: predicated region fallthrough
CT: control target
= control target key end

     0   :  { %8 = vsyncpa [#allocation5], 0  ;;  %s1392_s0 = inlined_call_operand.hbm [shape: f32[128,512], index: 0, kind: input, shape index: {}]   ;;  %s1393_s1 = inlined_call_operand.vmem [shape: f32[128,1], index: 1, kind: input, shape index: {}]   ;;  %s1394_s2 = inlined_call_operand.vmem [shape: f32[1,512], index: 2, kind: input, shape index: {}]   ;;  %s1395_s3 = inlined_call_operand.vmem [shape: f32[128,1], index: 3, kind: output, shape index: {}]  }
   0x1   :  { %10 = vsyncpa [#allocation5 + $0x1], 0  ;;  %s994_s12 = smov 0   ;;  %s996_s13 = smov 0  }
   0x2   :  { %s998_s14 = smov 0   ;;  %s1000_s15 = smov 0  }
   0x3   :  { %s1002_s16 = smov 0   ;;  %s1004_s17 = smov 0  }
   0x4   :  { %s1006_s18 = smov 0   ;;  %s1008_s19 = smov 0  }
   0x5 LB: > { %s705_s20 = sadd.s32 4294967295, %s965_s19   ;;  %s25_s21 = sadd.s32 1, %s957_s17  ;;  %s965_s19 = sphi %s1008_s19, %s16_s19   ;;  %s961_s18 = sphi %s1006_s18, %s1405_s18   ;;  %s957_s17 = sphi %s1004_s17, %s1404_s17   ;;  %s953_s16 = sphi %s1002_s16, %s1403_s16   ;;  %s949_s15 = sphi %s1000_s15, %s1402_s15   ;;  %s945_s14 = sphi %s998_s14, %s1401_s14   ;;  %s941_s13 = sphi %s996_s13, %s1400_s13   ;;  %s937_s12 = sphi %s994_s12, %s1399_s12  }
   0x6   : > { %p26_p0 = scmp.ge.s32.totalorder %s25_s21, 2  ;;  %s28_s22 = sadd.s32 1, %s961_s18 }
   0x7   : > { %s37_s23 = sadd.s32 1, %s945_s14  ;;  %p44_p1 = scmp.ne.s32.totalorder %s945_s14, %s941_s13 }
   0x8   : > { %s1407_s21 = smov (%p26_p0, %s25_s21), 0  ;;  %s1409_s22 = smov (!%p26_p0, %s28_s22), %s961_s18 }
   0x9   : > { %s33_s24 = ssub.s32 %s957_s17, %s1407_s21  ;;  %p45_p2 = scmp.eq.s32.totalorder %s965_s19, 0 }
   0xa   : > { %p30_p3 = scmp.ge.s32.totalorder %s1409_s22, 2  ;;  %p50_p4 = scmp.ne.s32.totalorder %s941_s13, %s937_s12 }
   0xb   : > { %p1045_p5 = por %p45_p2, %p44_p1  ;;  %p51_p6 = scmp.eq.s32.totalorder %s705_s20, 0 }
   0xc   : > { %s1411_s22 = smov (%p30_p3, %s1409_s22), 0  ;;  %p732_p8 = scmp.lt.s32.totalorder %s965_s19, 4 }
   0xd   : > { %p1051_p7 = por %p51_p6, %p50_p4  ;;  %s32_s27 = ssub.s32 %s961_s18, %s1411_s22 }
   0xe   : > { %s34_s28 = sor.u32 %s33_s24, %s32_s27  ;;  %s152_s29 = sand.u32 1, %s945_s14  }
   0xf   : > { %p35_p9 = scmp.eq.s32.totalorder %s34_s28, 0  ;;  %s709_s30 = sshll.u32 %s152_s29, 7 }
  0x10   : > { %s711_s4 = sshll.u32 %s957_s17, 1  ;;  %s725_s6 = sshll.u32 %s961_s18, 5 }
  0x11   : > { %s1061_s5 = scalar_select %p35_p9, %s945_s14, %s37_s23  }
  0x12   : > { %s163_s7 = sadd.s32 %s725_s6, %s711_s4  ;;  %s156_s8 = scalar_lea.vmem [#allocation4], %s709_s30 }
  0x13   : > { %s166_s9 = sshll.u32 %s156_s8, 4  ;;  %s713_s10 = sshll.u32 %s163_s7, 7  ;;  %s1064_s9 = int_to_ptr.vmem [resolvable:$true] %s166_s9 }
  0x14   : > { %s1069_s20 = scalar_lea.hbm %s1392_s0, %s713_s10  ;;  %p1075_p10 = pnand %p732_p8, %p1045_p5 }
  0x15   : > { %s1079_s24 = scalar_lea.sflag [#allocation5], %s152_s29  ;;  %s869_s27 = scalar_lea.hbm %s1069_s20, 2048 }
  0x16   : > { %p870_p11 = scmp.ne.s32.totalorder %s1069_s20, %s869_s27  ;;  %p871_p12 = pneg %p1075_p10 }
  0x17   : > { %s874_s30 = scalar_lea.hbm %s1392_s0, 8192  ;;  %p875_p1 = scmp.lt.u32.totalorder %s1069_s20, %s1392_s0 }
  0x18   : > { %p872_p13 = pnand %p871_p12, %p870_p11  ;;  %p876_p2 = scmp.lt.u32.totalorder %s874_s30, %s869_s27 }
  0x19   : > { %p878_p4 = scmp.lt.u32.totalorder %s869_s27, %s1069_s20 }
  0x1a   : > { %p873_p0 = pneg %p872_p13  ;;  %p877_p3 = por %p876_p2, %p875_p1 }
  0x1c   : > { %p879_p5 = por %p878_p4, %p877_p3 }
  0x1e   : > { %p880_p6 = pnand %p879_p5, %p873_p0 }
  0x20   : > { %883 = shalt.err (!%p880_p6)
}
  0x21   : > { %s884_s29 = scalar_lea.vmem %s1064_s9, 2048  ;;  %s967_s7 = smov [#allocation4]  }
  0x22   : > { %p885_p8 = scmp.ne.s32.totalorder %s1064_s9, %s884_s29  ;;  %s889_s8 = sshll.u32 %s967_s7, 4  ;;  %s890_s8 = int_to_ptr.vmem [resolvable:$false] %s889_s8 }
  0x23   : > { %s891_s10 = scalar_lea.vmem %s890_s8, 4096  ;;  %p892_p13 = scmp.lt.s32.totalorder %s1064_s9, %s890_s8 }
  0x24   : > { %p887_p9 = pnand %p885_p8, %p871_p12  ;;  %p893_p1 = scmp.lt.s32.totalorder %s891_s10, %s884_s29 }
  0x26   : > { %p888_p11 = pneg %p887_p9  ;;  %p894_p2 = por %p893_p1, %p892_p13 }
  0x28   : > { %p895_p3 = pnand %p894_p2, %p888_p11 }
  0x2a   : > { %898 = shalt.err (!%p895_p3)
}
  0x2b   : > { %s968_s11 = smov 512   ;;  %s969_s12 = smov 256  }
  0x2c   : > { %s970_s27 = smov 16   ;;  %p714_p12 = scmp.ge.s32.totalorder %s965_s19, 1 }
  0x2d   : > { %731 = dma.hbm_to_vmem [thread:$0]  (!%p1075_p10), %s1069_s20, 2048, %s1064_s9, %s1079_s24, %s968_s11, %s969_s12, %s970_s27  }
  0x2e   : > { %p191_p0 = scmp.lt.s32.totalorder %s965_s19, 5 }
  0x30   : > { %p192_p4 = pnand %p714_p12, %p191_p0 }
  0x31   : > { %s197_s25 = sand.u32 (!%p192_p4), 1, %s941_s13  }
  0x32   : > { %195 = sbr.rel (%p192_p4) target bundleno = 571 (0x23b), region = 32  ;;  %s715_s28 = sshll.u32 (!%p192_p4), %s197_s25, 7 }
  0x33   : > { %s198_s30 = scalar_lea.sflag (!%p192_p4), [#allocation5], %s197_s25  ;;  %s1110_s4 = scalar_lea.vmem (!%p192_p4), [#allocation4], %s715_s28 }
  0x39   : > { %932 = dma.done.wait (%p1051_p7), %s198_s30, 2048  }
  0x3a   : > { %934 = vsyncadd (%p1051_p7), %s198_s30, 4294965248  ;;  %s716_s23 = sshll.u32 %s953_s16, 3  ;;  %s718_s9 = sshll.u32 %s949_s15, 1 }
  0x3b   : > { %p236_p10 = scmp.lt.s32.totalorder %s716_s23, 15  ;;  %p242_p5 = scmp.lt.s32.totalorder %s718_s9, 3 }
  0x3c   : > { %p721_p7 = scmp.ne.s32.totalorder %s949_s15, 0 }
  0x3d   : > { %s1413_s23 = smov (!%p236_p10, %s716_s23), 15  ;;  %s1415_s9 = smov (!%p242_p5, %s718_s9), 3 }
  0x3e   : > { %s717_s20 = sshll.u32 %s1413_s23, 3  ;;  %s244_s26 = scalar_lea.vmem %s1394_s2, %s1415_s9  ;;  %vm256_vm0 = vcmask (!%p721_p7), 7168   ;;  %v971_v0 = vmov (!%p721_p7), -inf   ;;  %v972_v1 = vmov (!%p721_p7), 0.0  }
  0x3f   : > { %s1123_s29 = scalar_lea.vmem %s1393_s1, %s717_s20  ;;  %s1132_s16 = scalar_lea.vmem %s1395_s3, %s717_s20  ;;  %257 = vst.msk [vmem:[#allocation2] sm:$0xff] (!%p721_p7), %vm256_vm0, %v971_v0  ;;  %258 = vst.msk [vmem:[#allocation2 + $0x8] sm:$0xff] (!%p721_p7), %vm256_vm0, %v971_v0 }
  0x40   : > { %255 = sbr.rel (%p721_p7) target bundleno = 71 (0x47), region = 40  ;;  %259 = vst.msk [vmem:[#allocation2 + $0x10] sm:$0xff] (!%p721_p7), %vm256_vm0, %v971_v0  ;;  %260 = vst.msk [vmem:[#allocation2 + $0x18] sm:$0xff] (!%p721_p7), %vm256_vm0, %v971_v0 }
  0x41   : > { %261 = vst.msk [vmem:[#allocation2 + $0x20] sm:$0xff] (!%p721_p7), %vm256_vm0, %v971_v0  ;;  %262 = vst.msk [vmem:[#allocation2 + $0x28] sm:$0xff] (!%p721_p7), %vm256_vm0, %v971_v0 }
  0x42   : > { %263 = vst.msk [vmem:[#allocation2 + $0x30] sm:$0xff] (!%p721_p7), %vm256_vm0, %v971_v0  ;;  %264 = vst.msk [vmem:[#allocation2 + $0x38] sm:$0xff] (!%p721_p7), %vm256_vm0, %v971_v0 }
  0x43   : > { %265 = vst.msk [vmem:[#allocation3] sm:$0xff] (!%p721_p7), %vm256_vm0, %v972_v1  ;;  %266 = vst.msk [vmem:[#allocation3 + $0x8] sm:$0xff] (!%p721_p7), %vm256_vm0, %v972_v1 }
  0x44   : > { %267 = vst.msk [vmem:[#allocation3 + $0x10] sm:$0xff] (!%p721_p7), %vm256_vm0, %v972_v1  ;;  %268 = vst.msk [vmem:[#allocation3 + $0x18] sm:$0xff] (!%p721_p7), %vm256_vm0, %v972_v1 }
  0x45   : > { %269 = vst.msk [vmem:[#allocation3 + $0x20] sm:$0xff] (!%p721_p7), %vm256_vm0, %v972_v1  ;;  %270 = vst.msk [vmem:[#allocation3 + $0x28] sm:$0xff] (!%p721_p7), %vm256_vm0, %v972_v1 }
  0x46   : > { %271 = vst.msk [vmem:[#allocation3 + $0x30] sm:$0xff] (!%p721_p7), %vm256_vm0, %v972_v1  ;;  %272 = vst.msk [vmem:[#allocation3 + $0x38] sm:$0xff] (!%p721_p7), %vm256_vm0, %v972_v1 }
  0x47 PF: > { %v291_v2 = vlaneseq  ;;  %v289_v4 = vld [vmem:[%s244_s26] sm:$0x3]  ;;  %v274_v6 = vld [vmem:[%s1110_s4 + $0x8] sm:$0xff]  ;;  %v275_v9 = vld [vmem:[%s1110_s4 + $0x10] sm:$0xff]  ;;  %v973_v49 = vmov 0   ;;  %vm517_vm1 = vcmask 7168  }
  0x48   : > { %v273_v5 = vld [vmem:[%s1110_s4] sm:$0xff]  ;;  %v276_v10 = vld [vmem:[%s1110_s4 + $0x18] sm:$0xff]  ;;  %v278_v14 = vld [vmem:[%s1110_s4 + $0x28] sm:$0xff]  ;;  %803 = vset.pattern.permute.xlu0 %v973_v49  ;;  %804 = vset.pattern.permute.xlu1 %v973_v49  ;;  %p722_p6 = scmp.ne.s32.totalorder %s949_s15, 1 }
  0x49   : > { %v292_v3 = vshrl.u32 %v291_v2, 7  ;;  %v277_v11 = vld [vmem:[%s1110_s4 + $0x20] sm:$0xff]  ;;  %v279_v15 = vld [vmem:[%s1110_s4 + $0x30] sm:$0xff]  ;;  %v280_v16 = vld [vmem:[%s1110_s4 + $0x38] sm:$0xff] }
  0x4a   : > { %v281_v25 = vld [vmem:[%s1110_s4 + $0x40] sm:$0xff]  ;;  %v282_v26 = vld [vmem:[%s1110_s4 + $0x48] sm:$0xff]  ;;  %v283_v28 = vld [vmem:[%s1110_s4 + $0x50] sm:$0xff] }
  0x4b   : > { %v293_v7 = vsub.s32 0, %v292_v3  ;;  %v297_v8 = vsub.s32 1, %v292_v3  ;;  %v284_v29 = vld [vmem:[%s1110_s4 + $0x58] sm:$0xff]  ;;  %v285_v37 = vld [vmem:[%s1110_s4 + $0x60] sm:$0xff]  ;;  %v286_v38 = vld [vmem:[%s1110_s4 + $0x68] sm:$0xff] }
  0x4c   : > { %v287_v39 = vld [vmem:[%s1110_s4 + $0x70] sm:$0xff]  ;;  %v288_v40 = vld [vmem:[%s1110_s4 + $0x78] sm:$0xff]  ;;  %v1215_v50 = vld [vmem:[#allocation2] sm:$0xff] }
  0x4d   : > { %v294_v12 = vrot.slane %v289_v4, %v293_v7  ;;  %v298_v13 = vrot.slane %v289_v4, %v297_v8  ;;  %v1217_v51 = vld [vmem:[#allocation2 + $0x10] sm:$0xff]  ;;  %v1222_v55 = vld [vmem:[#allocation2 + $0x8] sm:$0xff]  ;;  %v1232_v58 = vld [vmem:[#allocation2 + $0x18] sm:$0xff] }
  0x4e   : > { %v1244_v0 = vld [vmem:[#allocation2 + $0x20] sm:$0xff]  ;;  %v1251_v2 = vld [vmem:[#allocation2 + $0x28] sm:$0xff]  ;;  %v1263_v8 = vld [vmem:[#allocation2 + $0x30] sm:$0xff] }
  0x4f   : > { %v1159_v17 = vmul.f32 %v294_v12, %v273_v5  ;;  %v1161_v18 = vmul.f32 %v298_v13, %v274_v6  ;;  %v1163_v19 = vmul.f32 %v294_v12, %v275_v9  ;;  %v1165_v20 = vmul.f32 %v298_v13, %v276_v10  ;;  %v1270_v10 = vld [vmem:[#allocation2 + $0x38] sm:$0xff] }
  0x50   : > { %v1167_v21 = vmul.f32 %v294_v12, %v277_v11  ;;  %v1169_v22 = vmul.f32 %v298_v13, %v278_v14  ;;  %v1171_v23 = vmul.f32 %v294_v12, %v279_v15  ;;  %v1173_v24 = vmul.f32 %v298_v13, %v280_v16 }
  0x51   : > { %v325_v27 = vmax.f32 %v1159_v17, %v1161_v18  ;;  %v328_v31 = vmax.f32 %v1163_v19, %v1165_v20  ;;  %v1185_v32 = vmul.f32 %v294_v12, %v281_v25  ;;  %v1187_v33 = vmul.f32 %v298_v13, %v282_v26 }
  0x52   : > { %v331_v30 = vmax.f32 %v1167_v21, %v1169_v22  ;;  %v334_v34 = vmax.f32 %v1171_v23, %v1173_v24  ;;  %v1191_v35 = vmul.f32 %v294_v12, %v283_v28  ;;  %v1193_v36 = vmul.f32 %v298_v13, %v284_v29 }
  0x53   : > { %326 = vmax.xlane.f32.xlu0 %v325_v27  ;;  %v337_v41 = vmax.f32 %v1185_v32, %v1187_v33  ;;  %v1201_v42 = vmul.f32 %v294_v12, %v285_v37  ;;  %v1203_v43 = vmul.f32 %v298_v13, %v286_v38  ;;  %v1207_v45 = vmul.f32 %v294_v12, %v287_v39 }
  0x54   : > { %332 = vmax.xlane.f32.xlu1 %v331_v30  ;;  %v340_v44 = vmax.f32 %v1191_v35, %v1193_v36  ;;  %v1209_v46 = vmul.f32 %v298_v13, %v288_v40 }
  0x55   : > { %v343_v47 = vmax.f32 %v1201_v42, %v1203_v43 }
  0x56   : > { %v346_v48 = vmax.f32 %v1207_v45, %v1209_v46 }
  0x57   : > { %329 = vmax.xlane.f32.xlu0 %v328_v31 }
  0x58   : > { %335 = vmax.xlane.f32.xlu1 %v334_v34 }
  0x5b   : > { %338 = vmax.xlane.f32.xlu0 %v337_v41 }
  0x5c   : > { %341 = vmax.xlane.f32.xlu1 %v340_v44 }
  0x5f   : > { %344 = vmax.xlane.f32.xlu0 %v343_v47 }
  0x60   : > { %347 = vmax.xlane.f32.xlu1 %v346_v48 }
  0xe0   : > { %v327_v52 = vpop.xlane.xlu0 %326 }
  0xe1   : > { %v1220_v53 = vmax.f32 %v1215_v50, %v327_v52  ;;  %v333_v54 = vpop.xlane.xlu1 %332 }
  0xe2   : > { %v1225_v56 = vmax.f32 %v1217_v51, %v333_v54 }
  0xe3   : > { %v357_v57 = vsub.f32 %v1215_v50, %v1220_v53  ;;  %526 = vst.msk [vmem:[#allocation2] sm:$0xff] %vm517_vm1, %v1220_v53  ;;  %399 = vperm.xlu0 %803, %v1220_v53  }
  0xe4   : > { %v330_v59 = vpop.xlane.xlu0 %329  ;;  %v359_v60 = vsub.f32 %v1217_v51, %v1225_v56  ;;  %528 = vst.msk [vmem:[#allocation2 + $0x10] sm:$0xff] %vm517_vm1, %v1225_v56 }
  0xe5   : > { %v1239_v61 = vmax.f32 %v1222_v55, %v330_v59  ;;  %v336_v62 = vpop.xlane.xlu1 %335 }
  0xe6   : > { %v1242_v63 = vmax.f32 %v1232_v58, %v336_v62 }
  0xe7   : > { %v358_v1 = vsub.f32 %v1222_v55, %v1239_v61  ;;  %527 = vst.msk [vmem:[#allocation2 + $0x8] sm:$0xff] %vm517_vm1, %v1239_v61  ;;  %404 = vperm.xlu1 %804, %v1239_v61   ;;  %v382_v61 = vld [vmem:[#allocation3 + $0x8] sm:$0xff] }
  0xe8   : > { %v360_v3 = vsub.f32 %v1232_v58, %v1242_v63  ;;  %529 = vst.msk [vmem:[#allocation2 + $0x18] sm:$0xff] %vm517_vm1, %v1242_v63  ;;  %v339_v4 = vpop.xlane.xlu0 %338 }
  0xe9   : > { %v1258_v5 = vmax.f32 %v1244_v0, %v339_v4  ;;  %v342_v6 = vpop.xlane.xlu1 %341 }
  0xea   : > { %v1261_v7 = vmax.f32 %v1251_v2, %v342_v6 }
  0xeb   : > { %409 = vperm.xlu1 %804, %v1225_v56   ;;  %v361_v9 = vsub.f32 %v1244_v0, %v1258_v5  ;;  %530 = vst.msk [vmem:[#allocation2 + $0x20] sm:$0xff] %vm517_vm1, %v1258_v5 }
  0xec   : > { %v362_v11 = vsub.f32 %v1251_v2, %v1261_v7  ;;  %531 = vst.msk [vmem:[#allocation2 + $0x28] sm:$0xff] %vm517_vm1, %v1261_v7  ;;  %v345_v12 = vpop.xlane.xlu0 %344 }
  0xed   : > { %v1277_v13 = vmax.f32 %v1263_v8, %v345_v12  ;;  %v348_v14 = vpop.xlane.xlu1 %347  ;;  %v373_v50 = vmul.f32 1.442695, %v361_v9 }
  0xee   : > { %v1280_v15 = vmax.f32 %v1270_v10, %v348_v14  ;;  %v375_v51 = vmul.f32 1.442695, %v362_v11 }
  0xef   : > { %414 = vperm.xlu1 %804, %v1242_v63   ;;  %v363_v16 = vsub.f32 %v1263_v8, %v1277_v13  ;;  %532 = vst.msk [vmem:[#allocation2 + $0x30] sm:$0xff] %vm517_vm1, %v1277_v13  ;;  %v383_v63 = vld [vmem:[#allocation3 + $0x10] sm:$0xff] }
  0xf0   : > { %v364_v25 = vsub.f32 %v1270_v10, %v1280_v15  ;;  %533 = vst.msk [vmem:[#allocation2 + $0x38] sm:$0xff] %vm517_vm1, %v1280_v15 }
  0xf1   : > { %v377_v0 = vmul.f32 1.442695, %v363_v16 }
  0xf3   : > { %419 = vperm.xlu1 %804, %v1258_v5  }
  0xf7   : > { %424 = vperm.xlu1 %804, %v1261_v7   ;;  %v379_v7 = vmul.f32 1.442695, %v364_v25  ;;  %v387_v25 = vld [vmem:[#allocation3 + $0x30] sm:$0xff] }
  0xfb   : > { %429 = vperm.xlu1 %804, %v1277_v13  }
  0xff   : > { %434 = vperm.xlu1 %804, %v1280_v15  }
 0x162   : > { %v400_v26 = vpop.permute.xlu0 %399 }
 0x163   : > { %v437_v27 = vsub.f32 %v1159_v17, %v400_v26  ;;  %v438_v28 = vsub.f32 %v1161_v18, %v400_v26 }
 0x165   : > { %v453_v29 = vmul.f32 1.442695, %v437_v27  ;;  %v455_v30 = vmul.f32 1.442695, %v438_v28 }
 0x166   : > { %v405_v31 = vpop.permute.xlu1 %404 }
 0x167   : > { %805 = vpow2.f32 %v453_v29  ;;  %v439_v34 = vsub.f32 %v1163_v19, %v405_v31  ;;  %v440_v37 = vsub.f32 %v1165_v20, %v405_v31 }
 0x168   : > { %807 = vpow2.f32 %v455_v30 }
 0x169   : > { %v457_v38 = vmul.f32 1.442695, %v439_v34  ;;  %v459_v39 = vmul.f32 1.442695, %v440_v37 }
 0x16a   : > { %v410_v40 = vpop.permute.xlu1 %409 }
 0x16b   : > { %809 = vpow2.f32 %v457_v38  ;;  %v441_v41 = vsub.f32 %v1167_v21, %v410_v40  ;;  %v442_v44 = vsub.f32 %v1169_v22, %v410_v40 }
 0x16c   : > { %811 = vpow2.f32 %v459_v39 }
 0x16d   : > { %v461_v17 = vmul.f32 1.442695, %v441_v41  ;;  %v463_v18 = vmul.f32 1.442695, %v442_v44 }
 0x16e   : > { %v415_v47 = vpop.permute.xlu1 %414 }
 0x16f   : > { %813 = vpow2.f32 %v461_v17  ;;  %v443_v48 = vsub.f32 %v1171_v23, %v415_v47  ;;  %v444_v19 = vsub.f32 %v1173_v24, %v415_v47 }
 0x170   : > { %815 = vpow2.f32 %v463_v18 }
 0x171   : > { %v806_v20 = vpop.eup %805  ;;  %v465_v49 = vmul.f32 1.442695, %v443_v48  ;;  %v467_v52 = vmul.f32 1.442695, %v444_v19 }
 0x172   : > { %v808_v54 = vpop.eup %807  ;;  %v420_v59 = vpop.permute.xlu1 %419 }
 0x173   : > { %817 = vpow2.f32 %v465_v49  ;;  %v445_v21 = vsub.f32 %v1185_v32, %v420_v59  ;;  %v446_v22 = vsub.f32 %v1187_v33, %v420_v59  ;;  %v485_v62 = vadd.f32 %v808_v54, %v806_v20 }
 0x174   : > { %819 = vpow2.f32 %v467_v52 }
 0x175   : > { %v810_v4 = vpop.eup %809  ;;  %v469_v6 = vmul.f32 1.442695, %v445_v21  ;;  %v471_v12 = vmul.f32 1.442695, %v446_v22  ;;  %486 = vadd.xlane.f32.xlu1 %v485_v62  ;;  %v365_v22 = vmul.f32 1.442695, %v357_v57 }
 0x176   : > { %v812_v23 = vpop.eup %811  ;;  %v425_v14 = vpop.permute.xlu1 %424  ;;  %v367_v62 = vmul.f32 1.442695, %v358_v1 }
 0x177   : > { %821 = vpow2.f32 %v469_v6  ;;  %v447_v24 = vsub.f32 %v1191_v35, %v425_v14  ;;  %v448_v26 = vsub.f32 %v1193_v36, %v425_v14  ;;  %v488_v27 = vadd.f32 %v812_v23, %v810_v4  ;;  %v381_v23 = vld [vmem:[#allocation3] sm:$0xff] }
 0x178   : > { %823 = vpow2.f32 %v471_v12  ;;  %v369_v4 = vmul.f32 1.442695, %v359_v60  ;;  %v371_v6 = vmul.f32 1.442695, %v360_v3 }
 0x179   : > { %v814_v28 = vpop.eup %813  ;;  %v473_v29 = vmul.f32 1.442695, %v447_v24  ;;  %v475_v32 = vmul.f32 1.442695, %v448_v26  ;;  %489 = vadd.xlane.f32.xlu0 %v488_v27  ;;  %v384_v24 = vld [vmem:[#allocation3 + $0x18] sm:$0xff] }
 0x17a   : > { %v816_v33 = vpop.eup %815  ;;  %v430_v30 = vpop.permute.xlu1 %429 }
 0x17b   : > { %825 = vpow2.f32 %v473_v29  ;;  %v449_v31 = vsub.f32 %v1201_v42, %v430_v30  ;;  %v450_v34 = vsub.f32 %v1203_v43, %v430_v30  ;;  %v491_v37 = vadd.f32 %v816_v33, %v814_v28  ;;  %v385_v28 = vld [vmem:[#allocation3 + $0x20] sm:$0xff] }
 0x17c   : > { %827 = vpow2.f32 %v475_v32  ;;  %v386_v32 = vld [vmem:[#allocation3 + $0x28] sm:$0xff] }
 0x17d   : > { %v818_v38 = vpop.eup %817  ;;  %v477_v39 = vmul.f32 1.442695, %v449_v31  ;;  %v479_v35 = vmul.f32 1.442695, %v450_v34  ;;  %492 = vadd.xlane.f32.xlu0 %v491_v37 }
 0x17e   : > { %v820_v36 = vpop.eup %819  ;;  %v435_v40 = vpop.permute.xlu1 %434 }
 0x17f   : > { %829 = vpow2.f32 %v477_v39  ;;  %v451_v41 = vsub.f32 %v1207_v45, %v435_v40  ;;  %v452_v44 = vsub.f32 %v1209_v46, %v435_v40  ;;  %v494_v17 = vadd.f32 %v820_v36, %v818_v38  ;;  %v388_v39 = vld [vmem:[#allocation3 + $0x38] sm:$0xff] }
 0x180   : > { %831 = vpow2.f32 %v479_v35 }
 0x181   : > { %v822_v18 = vpop.eup %821  ;;  %v481_v47 = vmul.f32 1.442695, %v451_v41  ;;  %v483_v42 = vmul.f32 1.442695, %v452_v44  ;;  %495 = vadd.xlane.f32.xlu1 %v494_v17 }
 0x182   : > { %v824_v43 = vpop.eup %823 }
 0x183   : > { %833 = vpow2.f32 %v481_v47  ;;  %v497_v48 = vadd.f32 %v824_v43, %v822_v18 }
 0x184   : > { %835 = vpow2.f32 %v483_v42 }
 0x185   : > { %v826_v19 = vpop.eup %825  ;;  %498 = vadd.xlane.f32.xlu0 %v497_v48  ;;  %837 = vpow2.f32 %v365_v22  ;;  %v540_v22 = vld [vmem:[#allocation2 + $0x10] sm:$0xff] (!%p722_p6) }
 0x186   : > { %v828_v20 = vpop.eup %827  ;;  %839 = vpow2.f32 %v367_v62 }
 0x187   : > { %v500_v49 = vadd.f32 %v828_v20, %v826_v19  ;;  %841 = vpow2.f32 %v369_v4 }
 0x188   : > { %843 = vpow2.f32 %v371_v6  ;;  %v579_v6 = vld [vmem:[%s1123_s29 + $0x8] sm:$0xff] (!%p722_p6) }
 0x189   : > { %v830_v52 = vpop.eup %829  ;;  %501 = vadd.xlane.f32.xlu1 %v500_v49  ;;  %845 = vpow2.f32 %v373_v50  ;;  %v538_v49 = vld [vmem:[#allocation2] sm:$0xff] (!%p722_p6) }
 0x18a   : > { %v832_v54 = vpop.eup %831  ;;  %847 = vpow2.f32 %v375_v51 }
 0x18b   : > { %v503_v45 = vadd.f32 %v832_v54, %v830_v52  ;;  %849 = vpow2.f32 %v377_v0 }
 0x18c   : > { %851 = vpow2.f32 %v379_v7 }
 0x18d   : > { %v834_v59 = vpop.eup %833  ;;  %504 = vadd.xlane.f32.xlu0 %v503_v45  ;;  %v539_v45 = vld [vmem:[#allocation2 + $0x8] sm:$0xff] (!%p722_p6) }
 0x18e   : > { %v836_v46 = vpop.eup %835 }
 0x18f   : > { %v506_v21 = vadd.f32 %v836_v46, %v834_v59  ;;  %v838_v12 = vpop.eup %837  ;;  %v578_v46 = vld [vmem:[%s1123_s29] sm:$0xff] (!%p722_p6) }
 0x190   : > { %v389_v53 = vmul.f32 %v838_v12, %v381_v23  ;;  %v840_v55 = vpop.eup %839  ;;  %v541_v23 = vld [vmem:[#allocation2 + $0x18] sm:$0xff] (!%p722_p6) }
 0x191   : > { %507 = vadd.xlane.f32.xlu1 %v506_v21  ;;  %v390_v56 = vmul.f32 %v840_v55, %v382_v61  ;;  %v842_v58 = vpop.eup %841  ;;  %v580_v55 = vld [vmem:[%s1123_s29 + $0x10] sm:$0xff] (!%p722_p6)  ;;  %v542_v61 = vld [vmem:[#allocation2 + $0x20] sm:$0xff] (!%p722_p6) }
 0x192   : > { %v391_v5 = vmul.f32 %v842_v58, %v383_v63  ;;  %v844_v9 = vpop.eup %843  ;;  %v581_v58 = vld [vmem:[%s1123_s29 + $0x18] sm:$0xff] (!%p722_p6)  ;;  %v543_v63 = vld [vmem:[#allocation2 + $0x28] sm:$0xff] (!%p722_p6) }
 0x193   : > { %v392_v11 = vmul.f32 %v844_v9, %v384_v24  ;;  %v846_v26 = vpop.eup %845  ;;  %v582_v9 = vld [vmem:[%s1123_s29 + $0x20] sm:$0xff] (!%p722_p6)  ;;  %v544_v24 = vld [vmem:[#allocation2 + $0x30] sm:$0xff] (!%p722_p6) }
 0x194   : > { %v393_v13 = vmul.f32 %v846_v26, %v385_v28  ;;  %v848_v16 = vpop.eup %847  ;;  %v583_v26 = vld [vmem:[%s1123_s29 + $0x28] sm:$0xff] (!%p722_p6)  ;;  %v545_v28 = vld [vmem:[#allocation2 + $0x38] sm:$0xff] (!%p722_p6) }
 0x195   : > { %v394_v30 = vmul.f32 %v848_v16, %v386_v32  ;;  %v850_v10 = vpop.eup %849  ;;  %v584_v16 = vld [vmem:[%s1123_s29 + $0x30] sm:$0xff] (!%p722_p6) }
 0x196   : > { %v395_v34 = vmul.f32 %v850_v10, %v387_v25  ;;  %v852_v37 = vpop.eup %851 }
 0x197   : > { %v396_v36 = vmul.f32 %v852_v37, %v388_v39 }
 0x202   : > { %v487_v57 = vpop.xlane.xlu1 %486 }
 0x203   : > { %v509_v1 = vadd.f32 %v487_v57, %v389_v53 }
 0x205   : > { %518 = vst.msk [vmem:[#allocation3] sm:$0xff] %vm517_vm1, %v509_v1 }
 0x206   : > { %v490_v60 = vpop.xlane.xlu0 %489 }
 0x207   : > { %v510_v3 = vadd.f32 %v490_v60, %v390_v56 }
 0x209   : > { %519 = vst.msk [vmem:[#allocation3 + $0x8] sm:$0xff] %vm517_vm1, %v510_v3 }
 0x20a   : > { %v493_v14 = vpop.xlane.xlu0 %492 }
 0x20b   : > { %v511_v2 = vadd.f32 %v493_v14, %v391_v5 }
 0x20c   : > { %v546_v44 = vld [vmem:[#allocation3] sm:$0xff] (!%p722_p6) }
 0x20d   : > { %520 = vst.msk [vmem:[#allocation3 + $0x10] sm:$0xff] %vm517_vm1, %v511_v2  ;;  %853 = vlog2.f32 (!%p722_p6), %v546_v44 }
 0x20e   : > { %v496_v27 = vpop.xlane.xlu1 %495 }
 0x20f   : > { %v512_v8 = vadd.f32 %v496_v27, %v392_v11 }
 0x210   : > { %v547_v17 = vld [vmem:[#allocation3 + $0x8] sm:$0xff] (!%p722_p6) }
 0x211   : > { %521 = vst.msk [vmem:[#allocation3 + $0x18] sm:$0xff] %vm517_vm1, %v512_v8  ;;  %855 = vlog2.f32 (!%p722_p6), %v547_v17 }
 0x212   : > { %v499_v29 = vpop.xlane.xlu0 %498 }
 0x213   : > { %v513_v33 = vadd.f32 %v499_v29, %v393_v13 }
 0x214   : > { %v548_v18 = vld [vmem:[#allocation3 + $0x10] sm:$0xff] (!%p722_p6) }
 0x215   : > { %522 = vst.msk [vmem:[#allocation3 + $0x20] sm:$0xff] %vm517_vm1, %v513_v33  ;;  %857 = vlog2.f32 (!%p722_p6), %v548_v18 }
 0x216   : > { %v502_v15 = vpop.xlane.xlu1 %501 }
 0x217   : > { %v514_v31 = vadd.f32 %v502_v15, %v394_v30  ;;  %v854_v20 = vpop.eup (!%p722_p6), %853  ;;  %v585_v30 = vld [vmem:[%s1123_s29 + $0x38] sm:$0xff] (!%p722_p6) }
 0x218   : > { %v549_v47 = vld [vmem:[#allocation3 + $0x18] sm:$0xff] (!%p722_p6)  ;;  %v555_v54 = vmul.f32 (!%p722_p6), 0.6931472, %v854_v20 }
 0x219   : > { %523 = vst.msk [vmem:[#allocation3 + $0x28] sm:$0xff] %vm517_vm1, %v514_v31  ;;  %859 = vlog2.f32 (!%p722_p6), %v549_v47 }
 0x21a   : > { %v505_v38 = vpop.xlane.xlu0 %504  ;;  %v570_v4 = vadd.f32 (!%p722_p6), %v555_v54, %v538_v49 }
 0x21b   : > { %v515_v35 = vadd.f32 %v505_v38, %v395_v34  ;;  %537 = sbr.rel (%p722_p6) target bundleno = 571 (0x23b), region = 44  ;;  %v856_v52 = vpop.eup (!%p722_p6), %855 }
 0x21c   : > { %v550_v42 = vld [vmem:[#allocation3 + $0x20] sm:$0xff] (!%p722_p6)  ;;  %v557_v21 = vmul.f32 (!%p722_p6), 0.6931472, %v856_v52  ;;  %v586_v51 = vsub.f32 (!%p722_p6), %v570_v4, %v578_v46 }
 0x21d   : > { %524 = vst.msk [vmem:[#allocation3 + $0x30] sm:$0xff] %vm517_vm1, %v515_v35  ;;  %861 = vlog2.f32 (!%p722_p6), %v550_v42 }
 0x21e   : > { %v508_v40 = vpop.xlane.xlu1 %507  ;;  %v571_v53 = vadd.f32 (!%p722_p6), %v557_v21, %v539_v45  ;;  %594 = vst.msk [vmem:[%s1132_s16] sm:$0xff] (!%p722_p6), %vm517_vm1, %v586_v51 }
 0x21f   : > { %v516_v41 = vadd.f32 %v508_v40, %v396_v36  ;;  %v858_v59 = vpop.eup (!%p722_p6), %857 }
 0x220   : > { %v551_v43 = vld [vmem:[#allocation3 + $0x28] sm:$0xff] (!%p722_p6)  ;;  %v559_v12 = vmul.f32 (!%p722_p6), 0.6931472, %v858_v59  ;;  %v587_v0 = vsub.f32 (!%p722_p6), %v571_v53, %v579_v6 }
 0x221   : > { %525 = vst.msk [vmem:[#allocation3 + $0x38] sm:$0xff] %vm517_vm1, %v516_v41  ;;  %863 = vlog2.f32 (!%p722_p6), %v551_v43 }
 0x222   : > { %v572_v56 = vadd.f32 %v559_v12, %v540_v22  ;;  %595 = vst.msk [vmem:[%s1132_s16 + $0x8] sm:$0xff] %vm517_vm1, %v587_v0 }
 0x223   : > { %v860_v62 = vpop.eup %859 }
 0x224   : > { %v552_v48 = vld [vmem:[#allocation3 + $0x30] sm:$0xff]  ;;  %v561_v57 = vmul.f32 0.6931472, %v860_v62  ;;  %v588_v7 = vsub.f32 %v572_v56, %v580_v55 }
 0x225   : > { %865 = vlog2.f32 %v552_v48 }
 0x226   : > { %v573_v5 = vadd.f32 %v561_v57, %v541_v23  ;;  %596 = vst.msk [vmem:[%s1132_s16 + $0x10] sm:$0xff] %vm517_vm1, %v588_v7 }
 0x227   : > { %v862_v50 = vpop.eup %861 }
 0x228   : > { %v553_v19 = vld [vmem:[#allocation3 + $0x38] sm:$0xff]  ;;  %v563_v60 = vmul.f32 0.6931472, %v862_v50  ;;  %v589_v8 = vsub.f32 %v573_v5, %v581_v58 }
 0x229   : > { %867 = vlog2.f32 %v553_v19 }
 0x22a   : > { %v574_v11 = vadd.f32 %v563_v60, %v542_v61  ;;  %597 = vst.msk [vmem:[%s1132_s16 + $0x18] sm:$0xff] %vm517_vm1, %v589_v8 }
 0x22b   : > { %v864_v1 = vpop.eup %863 }
 0x22c   : > { %v565_v14 = vmul.f32 0.6931472, %v864_v1  ;;  %v590_v32 = vsub.f32 %v574_v11, %v582_v9 }
 0x22e   : > { %v575_v13 = vadd.f32 %v565_v14, %v543_v63  ;;  %598 = vst.msk [vmem:[%s1132_s16 + $0x20] sm:$0xff] %vm517_vm1, %v590_v32 }
 0x22f   : > { %v866_v3 = vpop.eup %865 }
 0x230   : > { %v567_v27 = vmul.f32 0.6931472, %v866_v3  ;;  %v591_v10 = vsub.f32 %v575_v13, %v583_v26 }
 0x232   : > { %v576_v33 = vadd.f32 %v567_v27, %v544_v24  ;;  %599 = vst.msk [vmem:[%s1132_s16 + $0x28] sm:$0xff] %vm517_vm1, %v591_v10 }
 0x233   : > { %v868_v2 = vpop.eup %867 }
 0x234   : > { %v569_v29 = vmul.f32 0.6931472, %v868_v2  ;;  %v592_v25 = vsub.f32 %v576_v33, %v584_v16 }
 0x236   : > { %v577_v15 = vadd.f32 %v569_v29, %v545_v28  ;;  %600 = vst.msk [vmem:[%s1132_s16 + $0x30] sm:$0xff] %vm517_vm1, %v592_v25 }
 0x238   : > { %v593_v31 = vsub.f32 %v577_v15, %v585_v30 }
 0x23a   : > { %601 = vst.msk [vmem:[%s1132_s16 + $0x38] sm:$0xff] %vm517_vm1, %v593_v31 }
 0x23b PF: > { %s16_s19 = sadd.s32 1, %s965_s19   ;;  %s1399_s12 = smov %s941_s13 }
 0x23c   : > { %p13_p8 = scmp.ge.s32.totalorder %s16_s19, 6   ;;  %s1400_s13 = smov %s945_s14 }
 0x23d   : > { %s1401_s14 = smov %s1061_s5  ;;  %s1402_s15 = smov %s957_s17 }
 0x23e   : > { %s1403_s16 = smov %s961_s18  ;;  %s1404_s17 = smov %s1407_s21 }
 0x23f   : > { %s1405_s18 = smov %s1411_s22  ;;  %15 = sbr.rel (!%p13_p8) target bundleno = 5 (0x5), region = 86 }
 0x246   :  { %624 = vsyncpa [#allocation5], 1 }
 0x247   :  { %626 = vsyncpa [#allocation5 + $0x1], 1 }

</bundles_post_ra>
